<compile_context>
chip_gen: v5e
topology: v5e:2x2
jax: 0.10.0
libtpu: 0.0.40
codegen_flags: <defaults>
</compile_context>

<pallas_src>
import jax
import jax.numpy as jnp
from jax.experimental import pallas as pl
from jax.experimental.pallas import tpu as pltpu


def _log1p(x):
    # Accurate log(1 + x) for x >= 0 (Kahan's trick), composed only of ops that
    # lower cleanly in Mosaic (log / div / where).
    # Note: when d == 0 the discarded branch computes x/d = 0/0 (NaN); the
    # elementwise select in jnp.where drops it, so the result is exact. Do not
    # "simplify" by hoisting the division out of the where.
    u = 1.0 + x
    d = u - 1.0
    return jnp.where(d == 0.0, x, jnp.log(u) * (x / d))


def _awl_kernel(losses_ref, params_ref, out_ref):
    # losses_ref, params_ref: (1, num) f32 in VMEM.  out_ref: (1, 1) f32 in SMEM.
    l = losses_ref[...]                      # one unmasked load
    p = params_ref[...]                      # one unmasked load
    p2 = p * p
    terms = 0.5 * l / p2 + _log1p(p2)        # full-precision divide (1e-6 tol)
    out_ref[0, 0] = jnp.sum(terms)


def automatic_weighted_loss(losses, params):
    """Pallas forward matching the PyTorch module. losses, params: (num,) arrays."""
    num = losses.shape[-1]
    l2 = losses.astype(jnp.float32).reshape(1, num)
    p2 = params.astype(jnp.float32).reshape(1, num)
    out = pl.pallas_call(
        _awl_kernel,
        out_shape=jax.ShapeDtypeStruct((1, 1), jnp.float32),
        in_specs=[
            pl.BlockSpec(memory_space=pltpu.MemorySpace.VMEM),
            pl.BlockSpec(memory_space=pltpu.MemorySpace.VMEM),
        ],
        out_specs=pl.BlockSpec(memory_space=pltpu.MemorySpace.SMEM),
        cost_estimate=pl.CostEstimate(
            flops=6 * num, transcendentals=num, bytes_accessed=8 * num + 4),
    )(l2, p2)
    return out[0, 0]


def automatic_weighted_loss_inline(losses, params):
    """Recommended production path: plain JAX, fuses into the surrounding loss
    graph and is differentiable w.r.t. params."""
    p2 = params.astype(jnp.float32) ** 2
    return jnp.sum(0.5 * losses.astype(jnp.float32) / p2 + jnp.log1p(p2))


if __name__ == "__main__":
    num = 2  # matches AutomaticWeightedLoss(num=2)

    # Deterministic parameter init, matching torch.ones(num).
    params = jnp.ones((num,), dtype=jnp.float32)

    # Deterministic example per-task losses (the forward's input x).
    key = jax.random.PRNGKey(0)
    losses = jax.random.uniform(key, (num,), dtype=jnp.float32,
                                minval=0.1, maxval=2.0)

    fn = jax.jit(automatic_weighted_loss)
    result = jax.block_until_ready(fn(losses, params))

    # Pure-JAX reference check (same math as the PyTorch forward).
    ref = automatic_weighted_loss_inline(losses, params)
    assert jnp.allclose(result, ref, rtol=1e-6, atol=1e-6), (result, ref)

    print("KERNEL_OK")
</pallas_src>

<mosaic_0001>
module attributes {stable_mosaic.version = 11 : i64} {
  func.func @_awl_kernel(%arg0: memref<1x2xf32, #tpu.memory_space<vmem>>, %arg1: memref<1x2xf32, #tpu.memory_space<vmem>>, %arg2: memref<1x1xf32, #tpu.memory_space<smem>>) attributes {dimension_semantics = [], scalar_prefetch = 0 : i64, scratch_operands = 0 : i64, tpu.core_type = #tpu.core_type<tc>} {
    %c0 = arith.constant 0 : index
    %c0_0 = arith.constant 0 : index
    %0 = vector.load %arg0[%c0, %c0_0] : memref<1x2xf32, #tpu.memory_space<vmem>>, vector<1x2xf32>
    %c0_1 = arith.constant 0 : index
    %c0_2 = arith.constant 0 : index
    %1 = vector.load %arg1[%c0_1, %c0_2] : memref<1x2xf32, #tpu.memory_space<vmem>>, vector<1x2xf32>
    %2 = arith.mulf %1, %1 : vector<1x2xf32>
    %cst = arith.constant 5.000000e-01 : f32
    %3 = vector.broadcast %cst : f32 to vector<1x2xf32>
    %4 = arith.mulf %3, %0 : vector<1x2xf32>
    %5 = arith.divf %4, %2 : vector<1x2xf32>
    %cst_3 = arith.constant 1.000000e+00 : f32
    %6 = vector.broadcast %cst_3 : f32 to vector<1x2xf32>
    %7 = arith.addf %6, %2 : vector<1x2xf32>
    %cst_4 = arith.constant 1.000000e+00 : f32
    %8 = vector.broadcast %cst_4 : f32 to vector<1x2xf32>
    %9 = arith.subf %7, %8 : vector<1x2xf32>
    %cst_5 = arith.constant 0.000000e+00 : f32
    %10 = vector.broadcast %cst_5 : f32 to vector<1x2xf32>
    %11 = arith.cmpf oeq, %9, %10 : vector<1x2xf32>
    %12 = math.log %7 : vector<1x2xf32>
    %13 = arith.divf %2, %9 : vector<1x2xf32>
    %14 = arith.mulf %12, %13 : vector<1x2xf32>
    %15 = arith.select %11, %2, %14 : vector<1x2xi1>, vector<1x2xf32>
    %16 = arith.addf %5, %15 : vector<1x2xf32>
    %17 = vector.shape_cast %16 : vector<1x2xf32> to vector<1x1x2xf32>
    %cst_6 = arith.constant dense<0.000000e+00> : vector<1xf32>
    %18 = vector.multi_reduction <add>, %17, %cst_6 [1, 2] : vector<1x1x2xf32> to vector<1xf32>
    %19 = vector.shape_cast %18 : vector<1xf32> to vector<1x1x1xf32>
    %20 = vector.extract %19[0, 0, 0] : f32 from vector<1x1x1xf32>
    %c0_7 = arith.constant 0 : index
    %c0_8 = arith.constant 0 : index
    %21 = memref.load %arg2[%c0_7, %c0_8] : memref<1x1xf32, #tpu.memory_space<smem>>
    memref.store %20, %arg2[%c0_7, %c0_8] : memref<1x1xf32, #tpu.memory_space<smem>>
    return
  }
}

</mosaic_0001>

<bundles_post_ra>
// kernel: automatic_weighted_loss.1
= control target key start
LH: loop header
LB: loop body
LE: loop exit
PB: predicated region body
PF: predicated region fallthrough
CT: control target
= control target key end

     0   :  { %s137_s0 = inlined_call_operand.vmem [shape: f32[1,2], index: 0, kind: input, shape index: {}]   ;;  %s138_s1 = inlined_call_operand.vmem [shape: f32[1,2], index: 1, kind: input, shape index: {}]   ;;  %s139_s2 = inlined_call_operand.hbm [shape: f32[1,1], index: 2, kind: output, shape index: {}]  }
   0x1   :  { %v13_v0 = vld [vmem:[%s138_s1] sm:$0x1] }
   0x2   :  { %v14_v1 = vmul.f32 %v13_v0, %v13_v0 }
   0x3   :  { %7 = vsyncpa [#allocation3], 0  ;;  %v12_v17 = vld [vmem:[%s137_s0] sm:$0x1]  ;;  %vm54_vm9 = vcmask 8192   ;;  %s72_s13 = sshll.u32 %s139_s2, 4  ;;  %s73_s13 = int_to_ptr.hbm [resolvable:$true] %s72_s13 }
   0x4   :  { %86 = vrcp.f32 %v14_v1  ;;  %v31_v2 = vadd.f32 1.0, %v14_v1  ;;  %vm21_vm0 = vweird.f32 %v14_v1  ;;  %v27_v9 = vand.u32 2147483648, %v14_v1  ;;  %s106_s15 = smov [#allocation2]  }
   0x5   :  { %v25_v12 = vand.u32 2147483647, %v14_v1  ;;  %v15_v24 = vmul.f32 0.5, %v12_v17 }
   0x6   :  { %v82_v3 = vadd.f32 -1.0, %v31_v2  ;;  %v28_v18 = vor.u32 1.1754944e-38, %v27_v9 }
   0x7   :  { %vm26_vm5 = vcmp.eq.f32.partialorder %v25_v12, 8.507059e+37 }
   0x8   :  { %88 = vrcp.f32 %v82_v3  ;;  %v47_v13 = vand.u32 2147483648, %v82_v3  ;;  %vm41_vm3 = vweird.f32 %v82_v3  ;;  %v45_v16 = vand.u32 2147483647, %v82_v3 }
   0x9   :  { %90 = vlog2.f32 %v31_v2  ;;  %vm33_vm8 = vcmp.eq.f32.partialorder %v82_v3, 0.0 }
   0xa   :  { %v87_v4 = vpop.eup %86  ;;  %v48_v22 = vor.u32 1.1754944e-38, %v47_v13  ;;  %vm46_vm7 = vcmp.eq.f32.partialorder %v45_v16, 8.507059e+37 }
   0xb   :  { %v17_v5 = vmul.f32 %v87_v4, %v14_v1  ;;  %vm22_vm1 = vweird.f32 %v87_v4 }
   0xc   :  { %vm125_vm2 = vmor %vm21_vm0, %vm22_vm1 }
   0xd   :  { %v18_v6 = vsub.f32 1.0, %v17_v5 }
   0xe   :  { %v89_v7 = vpop.eup %88 }
   0xf   :  { %v19_v8 = vmul.f32 %v87_v4, %v18_v6  ;;  %v37_v10 = vmul.f32 %v89_v7, %v82_v3  ;;  %vm42_vm4 = vweird.f32 %v89_v7  ;;  %v91_v20 = vpop.eup %90 }
  0x10   :  { %vm43_vm6 = vmor %vm41_vm3, %vm42_vm4  ;;  %v35_v26 = vmul.f32 0.6931472, %v91_v20 }
  0x11   :  { %v20_v11 = vadd.f32 %v87_v4, %v19_v8  ;;  %v38_v15 = vsub.f32 1.0, %v37_v10 }
  0x13   :  { %v39_v19 = vmul.f32 %v89_v7, %v38_v15  ;;  %v24_v21 = vsel %vm125_vm2, %v87_v4, %v20_v11 }
  0x14   :  { %v29_v25 = vsel %vm26_vm5, %v28_v18, %v24_v21 }
  0x15   :  { %v40_v23 = vadd.f32 %v89_v7, %v39_v19  ;;  %v30_v30 = vmul.f32 %v29_v25, %v15_v24 }
  0x17   :  { %v44_v27 = vsel %vm43_vm6, %v89_v7, %v40_v23 }
  0x18   :  { %v49_v28 = vsel %vm46_vm7, %v48_v22, %v44_v27 }
  0x19   :  { %v50_v29 = vmul.f32 %v49_v28, %v14_v1 }
  0x1b   :  { %v51_v31 = vmul.f32 %v50_v29, %v35_v26 }
  0x1d   :  { %v52_v32 = vsel %vm33_vm8, %v14_v1, %v51_v31 }
  0x1e   :  { %v53_v33 = vadd.f32 %v52_v32, %v30_v30 }
  0x20   :  { %v55_v34 = vsel %vm54_vm9, %v53_v33, 0.0 }
  0x21   :  { %56 = vadd.xlane.f32.xlu0 %v55_v34 }
  0x94   :  { %v57_v35 = vpop.xlane.xlu0 %56 }
  0x95   :  { %v58_v36 = vrot.slane %v57_v35, 4 }
  0x97   :  { %v59_v37 = vadd.f32 %v58_v36, %v57_v35 }
  0x99   :  { %v60_v38 = vrot.slane %v59_v37, 2 }
  0x9b   :  { %v61_v39 = vadd.f32 %v60_v38, %v59_v37 }
  0x9d   :  { %v62_v40 = vrot.slane %v61_v39, 1 }
  0x9f   :  { %v63_v41 = vadd.f32 %v62_v40, %v61_v39 }
  0xa1   :  { %83 = vpush %v63_v41 }
  0xd2   :  { %s84_s14 = spop %83 }
  0xd3   :  { %66 = sst [smem:[#allocation2]] %s84_s14 }
  0xd4   :  { %75 = dma.smem_to_hbm %s106_s15, 16, %s73_s13, [#allocation3]  }
  0xd5   :  { %104 = dma.done.wait [#allocation3], 16  }
  0xd6   :  { %105 = vsyncadd [#allocation3], 4294967280 }
  0xd7   :  { %80 = sfence }
  0xd8   :  { %81 = vsyncpa [#allocation3], 1 }

</bundles_post_ra>
